<compile_context>
chip_gen: v7x
topology: tpu7x:2x2x1
jax: 0.10.0
libtpu: 0.0.40
codegen_flags: <defaults>
</compile_context>

<pallas_src>
from functools import partial

import jax
import jax.numpy as jnp
from jax.experimental import pallas as pl
from jax.experimental.pallas import tpu as pltpu

WIDTH = 512              # module default `width` (parameterizable below)
ORTHO_RATIO = 0.2
RENDER_LOAD_SIZE = 1024


# ----------------------------------------------------------------------------- kernel
def _opt_lmk_kernel(scale_ref, scale_dis_ref, center_ref, center_dis_ref,
                    rot_ref, rot_dis_ref, data_ref, out_ref, *, half):
    """Inputs:
         scale_ref/scale_dis_ref : SMEM f32[1]
         center_ref/center_dis_ref : SMEM f32[3,1]
         rot_ref/rot_dis_ref     : SMEM f32[3,3]
         data_ref                : VMEM f32[8, NP]  rows: 0-2 xyz, 3-4 gt, 5 mask
       Output:
         out_ref : SMEM f32[11] = [loss, dL/ds, dL/dcx..dcz, dL/dr00..dr02, dL/dr10..dr12]
    """
    # --- calib (get_camera) on the scalar core; only rows 0-1 are needed -------
    kconst = half / (ORTHO_RATIO * (RENDER_LOAD_SIZE // 2))   # python float (=2.5 for w=512)
    s = scale_ref[0] + scale_dis_ref[0]
    a = kconst * s
    cx = center_ref[0, 0] + center_dis_ref[0, 0]
    cy = center_ref[1, 0] + center_dis_ref[1, 0]
    cz = center_ref[2, 0] + center_dis_ref[2, 0]
    r00 = rot_ref[0, 0] + rot_dis_ref[0, 0]
    r01 = rot_ref[0, 1] + rot_dis_ref[0, 1]
    r02 = rot_ref[0, 2] + rot_dis_ref[0, 2]
    r10 = rot_ref[1, 0] + rot_dis_ref[1, 0]
    r11 = rot_ref[1, 1] + rot_dis_ref[1, 1]
    r12 = rot_ref[1, 2] + rot_dis_ref[1, 2]

    # --- one vld of the static tile; rows as static value slices ---------------
    d = data_ref[...]                       # (8, NP) f32
    px, py, pz = d[0:1, :], d[1:2, :], d[2:3, :]
    gt0, gt1 = d[3:4, :], d[4:5, :]
    mask = d[5:6, :]                        # 1.0 valid / 0.0 padding

    ux, uy, uz = px - cx, py - cy, pz - cz
    q0 = r00 * ux + r01 * uy + r02 * uz     # R0 . (p - c)
    q1 = r10 * ux + r11 * uy + r12 * uz     # R1 . (p - c)
    # Note: calib row 0 ("y_coor") compares against lmk_gt[..., 0] and row 1
    # against lmk_gt[..., 1]; the x/y naming swap in lmk_proj cancels out
    # (lmk_2D = cat(y_coor, x_coor) with y_coor = pts[0]).
    e0 = (a * q0 + (half - 1.0)) - gt0
    e1 = (-a * q1 + (half - 1.0)) - gt1

    loss = jnp.sum((jnp.abs(e0) + jnp.abs(e1)) * mask)

    # --- fused analytic backward: masked sign reductions (XLU) -----------------
    def sgn(x):
        return jnp.where(x > 0.0, 1.0, 0.0) - jnp.where(x < 0.0, 1.0, 0.0)

    s0 = sgn(e0) * mask
    s1 = sgn(e1) * mask
    S0, S1 = jnp.sum(s0), jnp.sum(s1)
    A0x, A0y, A0z = jnp.sum(s0 * ux), jnp.sum(s0 * uy), jnp.sum(s0 * uz)
    A1x, A1y, A1z = jnp.sum(s1 * ux), jnp.sum(s1 * uy), jnp.sum(s1 * uz)
    Q0, Q1 = jnp.sum(s0 * q0), jnp.sum(s1 * q1)

    out_ref[0] = loss
    out_ref[1] = kconst * (Q0 - Q1)               # dL/d scale
    out_ref[2] = a * (r10 * S1 - r00 * S0)        # dL/d cx
    out_ref[3] = a * (r11 * S1 - r01 * S0)        # dL/d cy
    out_ref[4] = a * (r12 * S1 - r02 * S0)        # dL/d cz
    out_ref[5] = a * A0x                          # dL/d r00
    out_ref[6] = a * A0y                          # dL/d r01
    out_ref[7] = a * A0z                          # dL/d r02
    out_ref[8] = -a * A1x                         # dL/d r10
    out_ref[9] = -a * A1y                         # dL/d r11
    out_ref[10] = -a * A1z                        # dL/d r12
    # dL/d r2* == 0 (the z row never reaches the loss)


# ----------------------------------------------------------------------------- wrappers
def _smem_spec():
    return pl.BlockSpec(memory_space=pltpu.MemorySpace.SMEM)


def _opt_lmk_pallas(width, data, scale, center, rotation,
                    scale_dis, center_dis, rotation_dis):
    npad = data.shape[1]
    return pl.pallas_call(
        partial(_opt_lmk_kernel, half=float(width) / 2.0),
        out_shape=jax.ShapeDtypeStruct((11,), jnp.float32),
        in_specs=[_smem_spec(), _smem_spec(), _smem_spec(), _smem_spec(),
                  _smem_spec(), _smem_spec(),
                  pl.BlockSpec(memory_space=pltpu.MemorySpace.VMEM)],
        out_specs=_smem_spec(),
        cost_estimate=pl.CostEstimate(flops=40 * npad, transcendentals=0,
                                      bytes_accessed=8 * npad * 4 + 26 * 4 + 11 * 4),
    )(scale.astype(jnp.float32), scale_dis.astype(jnp.float32),
      center.astype(jnp.float32), center_dis.astype(jnp.float32),
      rotation.astype(jnp.float32), rotation_dis.astype(jnp.float32),
      data.astype(jnp.float32))


@partial(jax.custom_vjp, nondiff_argnums=(0,))
def opt_landmark_loss(width, data, scale, center, rotation,
                      scale_dis, center_dis, rotation_dis):
    """Forward loss (== OptLandmark.forward). Differentiable via fused analytic VJP."""
    return _opt_lmk_pallas(width, data, scale, center, rotation,
                           scale_dis, center_dis, rotation_dis)[0]


def _opt_lmk_fwd(width, data, scale, center, rotation,
                 scale_dis, center_dis, rotation_dis):
    out = _opt_lmk_pallas(width, data, scale, center, rotation,
                          scale_dis, center_dis, rotation_dis)
    return out[0], (out, data)


def _opt_lmk_bwd(width, res, g):
    out, data = res
    dscale = g * out[1:2]                                          # (1,)
    dcenter = (g * out[2:5]).reshape(3, 1)                         # (3,1)
    drot = (g * jnp.concatenate([out[5:11],
                                 jnp.zeros((3,), jnp.float32)])).reshape(3, 3)
    # Buffers (scale/center/rotation) get the same cotangent as their *_dis
    # offsets (they just add); the static landmark tile gets a zero cotangent.
    return (jnp.zeros_like(data), dscale, dcenter, drot, dscale, dcenter, drot)


opt_landmark_loss.defvjp(_opt_lmk_fwd, _opt_lmk_bwd)


def prepare_landmark_data(lmk_3D, lmk_gt):
    """One-time packing of the static landmark data into a single (8, NP) tile.
       Rows 0-2 = xyz, rows 3-4 = gt pixel coords, row 5 = validity mask."""
    n = lmk_3D.shape[2]
    npad = int(pl.cdiv(max(n, 1), 128)) * 128
    data = jnp.zeros((8, npad), jnp.float32)
    data = data.at[0:3, :n].set(lmk_3D[0].astype(jnp.float32))
    data = data.at[3:5, :n].set(lmk_gt[0].T.astype(jnp.float32))
    data = data.at[5, :n].set(1.0)
    return data


def opt_landmark_step(data, scale, center, rotation,
                      scale_dis, center_dis, rotation_dis, width=WIDTH):
    """Per-optimizer-step forward: one pallas launch (differentiable)."""
    return opt_landmark_loss(width, data, scale, center, rotation,
                             scale_dis, center_dis, rotation_dis)


def opt_landmark_forward(lmk_3D, lmk_gt, scale, center, rotation,
                         scale_dis, center_dis, rotation_dis, width=WIDTH):
    """Drop-in equivalent of OptLandmark.forward (packs the tile every call).
       Prefer prepare_landmark_data() once + opt_landmark_step() in a loop."""
    data = prepare_landmark_data(lmk_3D, lmk_gt)
    return opt_landmark_step(data, scale, center, rotation,
                             scale_dis, center_dis, rotation_dis, width)


# ----------------------------------------------------------------------------- pure-JAX reference
def get_camera(scale, center, rotation, scale_dis, center_dis, rotation_dis):
    """Exact replica of OptLandmark.get_camera (original matmul path)."""
    s = (scale + scale_dis)[0]
    c = center + center_dis
    R = rotation + rotation_dis
    translate = -jnp.matmul(R, c).reshape(3, 1)
    extrinsic = jnp.concatenate([R, translate], axis=1)
    extrinsic = jnp.concatenate(
        [extrinsic, jnp.array([[0.0, 0.0, 0.0, 1.0]], jnp.float32)], axis=0)
    scale_intrinsic = jnp.diag(
        jnp.array([s / ORTHO_RATIO, -s / ORTHO_RATIO, s / ORTHO_RATIO, 1.0]))
    inv = 1.0 / float(RENDER_LOAD_SIZE // 2)
    uv_intrinsic = jnp.diag(jnp.array([inv, inv, inv, 1.0], jnp.float32))
    trans_intrinsic = jnp.eye(4, dtype=jnp.float32)
    intrinsic = trans_intrinsic @ (uv_intrinsic @ scale_intrinsic)
    return intrinsic @ extrinsic


def reference_forward(lmk_3D, lmk_gt, scale, center, rotation,
                      scale_dis, center_dis, rotation_dis, width=WIDTH):
    calib = get_camera(scale, center, rotation, scale_dis, center_dis, rotation_dis)
    rot = calib[:3, :3]
    trans = calib[:3, 3:4]
    pts = rot @ lmk_3D[0] + trans                    # (3, N)
    half = width / 2.0
    y_coor = pts[0] * half + half - 1.0              # -> lmk_2D[..., 0]
    x_coor = pts[1] * half + half - 1.0              # -> lmk_2D[..., 1]
    lmk_2D = jnp.stack([y_coor, x_coor], axis=1)[None]
    return jnp.sum(jnp.abs(lmk_2D - lmk_gt))


# ----------------------------------------------------------------------------- main
if __name__ == "__main__":
    N = 68  # typical facial-landmark count
    key = jax.random.PRNGKey(0)
    k1, k2, k3, k4, k5 = jax.random.split(key, 5)

    lmk_3D = (jax.random.normal(k1, (1, 3, N), jnp.float32) * 0.1
              + jnp.array([0.0, 1.6, 0.0], jnp.float32).reshape(1, 3, 1))
    lmk_gt = jax.random.uniform(k2, (1, N, 2), jnp.float32,
                                minval=0.0, maxval=float(WIDTH))

    # Buffers from __init__ (exact values); *_dis given small non-zero values so
    # both the forward and the fused gradients are exercised at non-trivial points.
    scale = jnp.array([363.1], jnp.float32)
    center = jnp.array([[-0.001], [1.64], [-0.03]], jnp.float32)
    rotation = jnp.array([[0.9, 0.0, -0.04],
                          [0.001, 0.99, 0.023],
                          [0.037, -0.026, 0.89]], jnp.float32)
    scale_dis = jax.random.normal(k3, (1,), jnp.float32) * 0.5
    center_dis = jax.random.normal(k4, (3, 1), jnp.float32) * 0.01
    rotation_dis = jax.random.normal(k5, (3, 3), jnp.float32) * 0.01

    # Static packing hoisted out of the per-step path.
    data = jax.block_until_ready(prepare_landmark_data(lmk_3D, lmk_gt))

    # Forward only (one pallas launch).
    fwd = jax.jit(partial(opt_landmark_loss, WIDTH))
    loss_fwd = jax.block_until_ready(
        fwd(data, scale, center, rotation, scale_dis, center_dis, rotation_dis))

    # Fused fwd + analytic bwd: value_and_grad is still a single pallas launch.
    step = jax.jit(jax.value_and_grad(partial(opt_landmark_loss, WIDTH),
                                      argnums=(4, 5, 6)))
    loss, (g_s, g_c, g_r) = step(data, scale, center, rotation,
                                 scale_dis, center_dis, rotation_dis)
    loss = jax.block_until_ready(loss)

    # Pure-JAX reference (original get_camera matmul path) for loss + autodiff grads.
    def ref_loss_fn(sd, cd, rd):
        return reference_forward(lmk_3D, lmk_gt, scale, center, rotation,
                                 sd, cd, rd, WIDTH)

    ref_loss, (rg_s, rg_c, rg_r) = jax.value_and_grad(
        ref_loss_fn, argnums=(0, 1, 2))(scale_dis, center_dis, rotation_dis)
    ref_loss = jax.block_until_ready(ref_loss)

    def check(a, b, name, tol=2e-3):
        a = jnp.asarray(a, jnp.float32)
        b = jnp.asarray(b, jnp.float32)
        err = float(jnp.max(jnp.abs(a - b)) / jnp.maximum(jnp.max(jnp.abs(b)), 1.0))
        assert err < tol, (name, err)

    check(loss_fwd, ref_loss, "loss_fwd")
    check(loss, ref_loss, "loss")
    check(g_s, rg_s, "d_scale_dis")
    check(g_c, rg_c, "d_center_dis")
    check(g_r, rg_r, "d_rotation_dis")
    print("KERNEL_OK")
</pallas_src>

<mosaic_0001>
module attributes {stable_mosaic.version = 11 : i64} {
  func.func @_opt_lmk_kernel(%arg0: memref<1xf32, #tpu.memory_space<smem>>, %arg1: memref<1xf32, #tpu.memory_space<smem>>, %arg2: memref<3x1xf32, #tpu.memory_space<smem>>, %arg3: memref<3x1xf32, #tpu.memory_space<smem>>, %arg4: memref<3x3xf32, #tpu.memory_space<smem>>, %arg5: memref<3x3xf32, #tpu.memory_space<smem>>, %arg6: memref<8x128xf32, #tpu.memory_space<vmem>>, %arg7: memref<11xf32, #tpu.memory_space<smem>>) attributes {dimension_semantics = [], scalar_prefetch = 0 : i64, scratch_operands = 0 : i64, tpu.core_type = #tpu.core_type<tc>} {
    %c0 = arith.constant 0 : index
    %0 = memref.load %arg0[%c0] : memref<1xf32, #tpu.memory_space<smem>>
    %c0_0 = arith.constant 0 : index
    %1 = memref.load %arg1[%c0_0] : memref<1xf32, #tpu.memory_space<smem>>
    %2 = arith.addf %0, %1 : f32
    %cst = arith.constant 2.500000e+00 : f32
    %3 = arith.mulf %cst, %2 : f32
    %c0_1 = arith.constant 0 : index
    %c0_2 = arith.constant 0 : index
    %4 = memref.load %arg2[%c0_1, %c0_2] : memref<3x1xf32, #tpu.memory_space<smem>>
    %c0_3 = arith.constant 0 : index
    %c0_4 = arith.constant 0 : index
    %5 = memref.load %arg3[%c0_3, %c0_4] : memref<3x1xf32, #tpu.memory_space<smem>>
    %6 = arith.addf %4, %5 : f32
    %c1 = arith.constant 1 : index
    %c0_5 = arith.constant 0 : index
    %7 = memref.load %arg2[%c1, %c0_5] : memref<3x1xf32, #tpu.memory_space<smem>>
    %c1_6 = arith.constant 1 : index
    %c0_7 = arith.constant 0 : index
    %8 = memref.load %arg3[%c1_6, %c0_7] : memref<3x1xf32, #tpu.memory_space<smem>>
    %9 = arith.addf %7, %8 : f32
    %c2 = arith.constant 2 : index
    %c0_8 = arith.constant 0 : index
    %10 = memref.load %arg2[%c2, %c0_8] : memref<3x1xf32, #tpu.memory_space<smem>>
    %c2_9 = arith.constant 2 : index
    %c0_10 = arith.constant 0 : index
    %11 = memref.load %arg3[%c2_9, %c0_10] : memref<3x1xf32, #tpu.memory_space<smem>>
    %12 = arith.addf %10, %11 : f32
    %c0_11 = arith.constant 0 : index
    %c0_12 = arith.constant 0 : index
    %13 = memref.load %arg4[%c0_11, %c0_12] : memref<3x3xf32, #tpu.memory_space<smem>>
    %c0_13 = arith.constant 0 : index
    %c0_14 = arith.constant 0 : index
    %14 = memref.load %arg5[%c0_13, %c0_14] : memref<3x3xf32, #tpu.memory_space<smem>>
    %15 = arith.addf %13, %14 : f32
    %c0_15 = arith.constant 0 : index
    %c1_16 = arith.constant 1 : index
    %16 = memref.load %arg4[%c0_15, %c1_16] : memref<3x3xf32, #tpu.memory_space<smem>>
    %c0_17 = arith.constant 0 : index
    %c1_18 = arith.constant 1 : index
    %17 = memref.load %arg5[%c0_17, %c1_18] : memref<3x3xf32, #tpu.memory_space<smem>>
    %18 = arith.addf %16, %17 : f32
    %c0_19 = arith.constant 0 : index
    %c2_20 = arith.constant 2 : index
    %19 = memref.load %arg4[%c0_19, %c2_20] : memref<3x3xf32, #tpu.memory_space<smem>>
    %c0_21 = arith.constant 0 : index
    %c2_22 = arith.constant 2 : index
    %20 = memref.load %arg5[%c0_21, %c2_22] : memref<3x3xf32, #tpu.memory_space<smem>>
    %21 = arith.addf %19, %20 : f32
    %c1_23 = arith.constant 1 : index
    %c0_24 = arith.constant 0 : index
    %22 = memref.load %arg4[%c1_23, %c0_24] : memref<3x3xf32, #tpu.memory_space<smem>>
    %c1_25 = arith.constant 1 : index
    %c0_26 = arith.constant 0 : index
    %23 = memref.load %arg5[%c1_25, %c0_26] : memref<3x3xf32, #tpu.memory_space<smem>>
    %24 = arith.addf %22, %23 : f32
    %c1_27 = arith.constant 1 : index
    %c1_28 = arith.constant 1 : index
    %25 = memref.load %arg4[%c1_27, %c1_28] : memref<3x3xf32, #tpu.memory_space<smem>>
    %c1_29 = arith.constant 1 : index
    %c1_30 = arith.constant 1 : index
    %26 = memref.load %arg5[%c1_29, %c1_30] : memref<3x3xf32, #tpu.memory_space<smem>>
    %27 = arith.addf %25, %26 : f32
    %c1_31 = arith.constant 1 : index
    %c2_32 = arith.constant 2 : index
    %28 = memref.load %arg4[%c1_31, %c2_32] : memref<3x3xf32, #tpu.memory_space<smem>>
    %c1_33 = arith.constant 1 : index
    %c2_34 = arith.constant 2 : index
    %29 = memref.load %arg5[%c1_33, %c2_34] : memref<3x3xf32, #tpu.memory_space<smem>>
    %30 = arith.addf %28, %29 : f32
    %c0_35 = arith.constant 0 : index
    %c0_36 = arith.constant 0 : index
    %31 = vector.load %arg6[%c0_35, %c0_36] : memref<8x128xf32, #tpu.memory_space<vmem>>, vector<8x128xf32>
    %32 = vector.extract_strided_slice %31 {offsets = [0, 0], sizes = [1, 128], strides = [1, 1]} : vector<8x128xf32> to vector<1x128xf32>
    %33 = vector.extract_strided_slice %31 {offsets = [1, 0], sizes = [1, 128], strides = [1, 1]} : vector<8x128xf32> to vector<1x128xf32>
    %34 = vector.extract_strided_slice %31 {offsets = [2, 0], sizes = [1, 128], strides = [1, 1]} : vector<8x128xf32> to vector<1x128xf32>
    %35 = vector.extract_strided_slice %31 {offsets = [3, 0], sizes = [1, 128], strides = [1, 1]} : vector<8x128xf32> to vector<1x128xf32>
    %36 = vector.extract_strided_slice %31 {offsets = [4, 0], sizes = [1, 128], strides = [1, 1]} : vector<8x128xf32> to vector<1x128xf32>
    %37 = vector.extract_strided_slice %31 {offsets = [5, 0], sizes = [1, 128], strides = [1, 1]} : vector<8x128xf32> to vector<1x128xf32>
    %38 = vector.broadcast %6 : f32 to vector<1x128xf32>
    %39 = arith.subf %32, %38 : vector<1x128xf32>
    %40 = vector.broadcast %9 : f32 to vector<1x128xf32>
    %41 = arith.subf %33, %40 : vector<1x128xf32>
    %42 = vector.broadcast %12 : f32 to vector<1x128xf32>
    %43 = arith.subf %34, %42 : vector<1x128xf32>
    %44 = vector.broadcast %15 : f32 to vector<1x128xf32>
    %45 = arith.mulf %44, %39 : vector<1x128xf32>
    %46 = vector.broadcast %18 : f32 to vector<1x128xf32>
    %47 = arith.mulf %46, %41 : vector<1x128xf32>
    %48 = arith.addf %45, %47 : vector<1x128xf32>
    %49 = vector.broadcast %21 : f32 to vector<1x128xf32>
    %50 = arith.mulf %49, %43 : vector<1x128xf32>
    %51 = arith.addf %48, %50 : vector<1x128xf32>
    %52 = vector.broadcast %24 : f32 to vector<1x128xf32>
    %53 = arith.mulf %52, %39 : vector<1x128xf32>
    %54 = vector.broadcast %27 : f32 to vector<1x128xf32>
    %55 = arith.mulf %54, %41 : vector<1x128xf32>
    %56 = arith.addf %53, %55 : vector<1x128xf32>
    %57 = vector.broadcast %30 : f32 to vector<1x128xf32>
    %58 = arith.mulf %57, %43 : vector<1x128xf32>
    %59 = arith.addf %56, %58 : vector<1x128xf32>
    %60 = vector.broadcast %3 : f32 to vector<1x128xf32>
    %61 = arith.mulf %60, %51 : vector<1x128xf32>
    %cst_37 = arith.constant 2.550000e+02 : f32
    %62 = vector.broadcast %cst_37 : f32 to vector<1x128xf32>
    %63 = arith.addf %61, %62 : vector<1x128xf32>
    %64 = arith.subf %63, %35 : vector<1x128xf32>
    %cst_38 = arith.constant 0.000000e+00 : f32
    %65 = arith.subf %cst_38, %3 : f32
    %66 = vector.broadcast %65 : f32 to vector<1x128xf32>
    %67 = arith.mulf %66, %59 : vector<1x128xf32>
    %cst_39 = arith.constant 2.550000e+02 : f32
    %68 = vector.broadcast %cst_39 : f32 to vector<1x128xf32>
    %69 = arith.addf %67, %68 : vector<1x128xf32>
    %70 = arith.subf %69, %36 : vector<1x128xf32>
    %71 = math.absf %64 : vector<1x128xf32>
    %72 = math.absf %70 : vector<1x128xf32>
    %73 = arith.addf %71, %72 : vector<1x128xf32>
    %74 = arith.mulf %73, %37 : vector<1x128xf32>
    %75 = vector.shape_cast %74 : vector<1x128xf32> to vector<1x1x128xf32>
    %cst_40 = arith.constant dense<0.000000e+00> : vector<1xf32>
    %76 = vector.multi_reduction <add>, %75, %cst_40 [1, 2] : vector<1x1x128xf32> to vector<1xf32>
    %77 = vector.shape_cast %76 : vector<1xf32> to vector<1x1x1xf32>
    %78 = vector.extract %77[0, 0, 0] : f32 from vector<1x1x1xf32>
    %cst_41 = arith.constant 0.000000e+00 : f32
    %79 = vector.broadcast %cst_41 : f32 to vector<1x128xf32>
    %80 = arith.cmpf ogt, %64, %79 : vector<1x128xf32>
    %cst_42 = arith.constant 1.000000e+00 : f32
    %cst_43 = arith.constant 0.000000e+00 : f32
    %81 = vector.broadcast %cst_42 : f32 to vector<1x128xf32>
    %82 = vector.broadcast %cst_43 : f32 to vector<1x128xf32>
    %83 = arith.select %80, %81, %82 : vector<1x128xi1>, vector<1x128xf32>
    %cst_44 = arith.constant 0.000000e+00 : f32
    %84 = vector.broadcast %cst_44 : f32 to vector<1x128xf32>
    %85 = arith.cmpf olt, %64, %84 : vector<1x128xf32>
    %cst_45 = arith.constant 1.000000e+00 : f32
    %cst_46 = arith.constant 0.000000e+00 : f32
    %86 = vector.broadcast %cst_45 : f32 to vector<1x128xf32>
    %87 = vector.broadcast %cst_46 : f32 to vector<1x128xf32>
    %88 = arith.select %85, %86, %87 : vector<1x128xi1>, vector<1x128xf32>
    %89 = arith.subf %83, %88 : vector<1x128xf32>
    %90 = arith.mulf %89, %37 : vector<1x128xf32>
    %cst_47 = arith.constant 0.000000e+00 : f32
    %91 = vector.broadcast %cst_47 : f32 to vector<1x128xf32>
    %92 = arith.cmpf ogt, %70, %91 : vector<1x128xf32>
    %cst_48 = arith.constant 1.000000e+00 : f32
    %cst_49 = arith.constant 0.000000e+00 : f32
    %93 = vector.broadcast %cst_48 : f32 to vector<1x128xf32>
    %94 = vector.broadcast %cst_49 : f32 to vector<1x128xf32>
    %95 = arith.select %92, %93, %94 : vector<1x128xi1>, vector<1x128xf32>
    %cst_50 = arith.constant 0.000000e+00 : f32
    %96 = vector.broadcast %cst_50 : f32 to vector<1x128xf32>
    %97 = arith.cmpf olt, %70, %96 : vector<1x128xf32>
    %cst_51 = arith.constant 1.000000e+00 : f32
    %cst_52 = arith.constant 0.000000e+00 : f32
    %98 = vector.broadcast %cst_51 : f32 to vector<1x128xf32>
    %99 = vector.broadcast %cst_52 : f32 to vector<1x128xf32>
    %100 = arith.select %97, %98, %99 : vector<1x128xi1>, vector<1x128xf32>
    %101 = arith.subf %95, %100 : vector<1x128xf32>
    %102 = arith.mulf %101, %37 : vector<1x128xf32>
    %103 = vector.shape_cast %90 : vector<1x128xf32> to vector<1x1x128xf32>
    %cst_53 = arith.constant dense<0.000000e+00> : vector<1xf32>
    %104 = vector.multi_reduction <add>, %103, %cst_53 [1, 2] : vector<1x1x128xf32> to vector<1xf32>
    %105 = vector.shape_cast %104 : vector<1xf32> to vector<1x1x1xf32>
    %106 = vector.extract %105[0, 0, 0] : f32 from vector<1x1x1xf32>
    %107 = vector.shape_cast %102 : vector<1x128xf32> to vector<1x1x128xf32>
    %cst_54 = arith.constant dense<0.000000e+00> : vector<1xf32>
    %108 = vector.multi_reduction <add>, %107, %cst_54 [1, 2] : vector<1x1x128xf32> to vector<1xf32>
    %109 = vector.shape_cast %108 : vector<1xf32> to vector<1x1x1xf32>
    %110 = vector.extract %109[0, 0, 0] : f32 from vector<1x1x1xf32>
    %111 = arith.mulf %90, %39 : vector<1x128xf32>
    %112 = vector.shape_cast %111 : vector<1x128xf32> to vector<1x1x128xf32>
    %cst_55 = arith.constant dense<0.000000e+00> : vector<1xf32>
    %113 = vector.multi_reduction <add>, %112, %cst_55 [1, 2] : vector<1x1x128xf32> to vector<1xf32>
    %114 = vector.shape_cast %113 : vector<1xf32> to vector<1x1x1xf32>
    %115 = vector.extract %114[0, 0, 0] : f32 from vector<1x1x1xf32>
    %116 = arith.mulf %90, %41 : vector<1x128xf32>
    %117 = vector.shape_cast %116 : vector<1x128xf32> to vector<1x1x128xf32>
    %cst_56 = arith.constant dense<0.000000e+00> : vector<1xf32>
    %118 = vector.multi_reduction <add>, %117, %cst_56 [1, 2] : vector<1x1x128xf32> to vector<1xf32>
    %119 = vector.shape_cast %118 : vector<1xf32> to vector<1x1x1xf32>
    %120 = vector.extract %119[0, 0, 0] : f32 from vector<1x1x1xf32>
    %121 = arith.mulf %90, %43 : vector<1x128xf32>
    %122 = vector.shape_cast %121 : vector<1x128xf32> to vector<1x1x128xf32>
    %cst_57 = arith.constant dense<0.000000e+00> : vector<1xf32>
    %123 = vector.multi_reduction <add>, %122, %cst_57 [1, 2] : vector<1x1x128xf32> to vector<1xf32>
    %124 = vector.shape_cast %123 : vector<1xf32> to vector<1x1x1xf32>
    %125 = vector.extract %124[0, 0, 0] : f32 from vector<1x1x1xf32>
    %126 = arith.mulf %102, %39 : vector<1x128xf32>
    %127 = vector.shape_cast %126 : vector<1x128xf32> to vector<1x1x128xf32>
    %cst_58 = arith.constant dense<0.000000e+00> : vector<1xf32>
    %128 = vector.multi_reduction <add>, %127, %cst_58 [1, 2] : vector<1x1x128xf32> to vector<1xf32>
    %129 = vector.shape_cast %128 : vector<1xf32> to vector<1x1x1xf32>
    %130 = vector.extract %129[0, 0, 0] : f32 from vector<1x1x1xf32>
    %131 = arith.mulf %102, %41 : vector<1x128xf32>
    %132 = vector.shape_cast %131 : vector<1x128xf32> to vector<1x1x128xf32>
    %cst_59 = arith.constant dense<0.000000e+00> : vector<1xf32>
    %133 = vector.multi_reduction <add>, %132, %cst_59 [1, 2] : vector<1x1x128xf32> to vector<1xf32>
    %134 = vector.shape_cast %133 : vector<1xf32> to vector<1x1x1xf32>
    %135 = vector.extract %134[0, 0, 0] : f32 from vector<1x1x1xf32>
    %136 = arith.mulf %102, %43 : vector<1x128xf32>
    %137 = vector.shape_cast %136 : vector<1x128xf32> to vector<1x1x128xf32>
    %cst_60 = arith.constant dense<0.000000e+00> : vector<1xf32>
    %138 = vector.multi_reduction <add>, %137, %cst_60 [1, 2] : vector<1x1x128xf32> to vector<1xf32>
    %139 = vector.shape_cast %138 : vector<1xf32> to vector<1x1x1xf32>
    %140 = vector.extract %139[0, 0, 0] : f32 from vector<1x1x1xf32>
    %141 = arith.mulf %90, %51 : vector<1x128xf32>
    %142 = vector.shape_cast %141 : vector<1x128xf32> to vector<1x1x128xf32>
    %cst_61 = arith.constant dense<0.000000e+00> : vector<1xf32>
    %143 = vector.multi_reduction <add>, %142, %cst_61 [1, 2] : vector<1x1x128xf32> to vector<1xf32>
    %144 = vector.shape_cast %143 : vector<1xf32> to vector<1x1x1xf32>
    %145 = vector.extract %144[0, 0, 0] : f32 from vector<1x1x1xf32>
    %146 = arith.mulf %102, %59 : vector<1x128xf32>
    %147 = vector.shape_cast %146 : vector<1x128xf32> to vector<1x1x128xf32>
    %cst_62 = arith.constant dense<0.000000e+00> : vector<1xf32>
    %148 = vector.multi_reduction <add>, %147, %cst_62 [1, 2] : vector<1x1x128xf32> to vector<1xf32>
    %149 = vector.shape_cast %148 : vector<1xf32> to vector<1x1x1xf32>
    %150 = vector.extract %149[0, 0, 0] : f32 from vector<1x1x1xf32>
    %c0_63 = arith.constant 0 : index
    %151 = memref.load %arg7[%c0_63] : memref<11xf32, #tpu.memory_space<smem>>
    memref.store %78, %arg7[%c0_63] : memref<11xf32, #tpu.memory_space<smem>>
    %152 = arith.subf %145, %150 : f32
    %cst_64 = arith.constant 2.500000e+00 : f32
    %153 = arith.mulf %cst_64, %152 : f32
    %c1_65 = arith.constant 1 : index
    %154 = memref.load %arg7[%c1_65] : memref<11xf32, #tpu.memory_space<smem>>
    memref.store %153, %arg7[%c1_65] : memref<11xf32, #tpu.memory_space<smem>>
    %155 = arith.mulf %24, %110 : f32
    %156 = arith.mulf %15, %106 : f32
    %157 = arith.subf %155, %156 : f32
    %158 = arith.mulf %3, %157 : f32
    %c2_66 = arith.constant 2 : index
    %159 = memref.load %arg7[%c2_66] : memref<11xf32, #tpu.memory_space<smem>>
    memref.store %158, %arg7[%c2_66] : memref<11xf32, #tpu.memory_space<smem>>
    %160 = arith.mulf %27, %110 : f32
    %161 = arith.mulf %18, %106 : f32
    %162 = arith.subf %160, %161 : f32
    %163 = arith.mulf %3, %162 : f32
    %c3 = arith.constant 3 : index
    %164 = memref.load %arg7[%c3] : memref<11xf32, #tpu.memory_space<smem>>
    memref.store %163, %arg7[%c3] : memref<11xf32, #tpu.memory_space<smem>>
    %165 = arith.mulf %30, %110 : f32
    %166 = arith.mulf %21, %106 : f32
    %167 = arith.subf %165, %166 : f32
    %168 = arith.mulf %3, %167 : f32
    %c4 = arith.constant 4 : index
    %169 = memref.load %arg7[%c4] : memref<11xf32, #tpu.memory_space<smem>>
    memref.store %168, %arg7[%c4] : memref<11xf32, #tpu.memory_space<smem>>
    %170 = arith.mulf %3, %115 : f32
    %c5 = arith.constant 5 : index
    %171 = memref.load %arg7[%c5] : memref<11xf32, #tpu.memory_space<smem>>
    memref.store %170, %arg7[%c5] : memref<11xf32, #tpu.memory_space<smem>>
    %172 = arith.mulf %3, %120 : f32
    %c6 = arith.constant 6 : index
    %173 = memref.load %arg7[%c6] : memref<11xf32, #tpu.memory_space<smem>>
    memref.store %172, %arg7[%c6] : memref<11xf32, #tpu.memory_space<smem>>
    %174 = arith.mulf %3, %125 : f32
    %c7 = arith.constant 7 : index
    %175 = memref.load %arg7[%c7] : memref<11xf32, #tpu.memory_space<smem>>
    memref.store %174, %arg7[%c7] : memref<11xf32, #tpu.memory_space<smem>>
    %cst_67 = arith.constant 0.000000e+00 : f32
    %176 = arith.subf %cst_67, %3 : f32
    %177 = arith.mulf %176, %130 : f32
    %c8 = arith.constant 8 : index
    %178 = memref.load %arg7[%c8] : memref<11xf32, #tpu.memory_space<smem>>
    memref.store %177, %arg7[%c8] : memref<11xf32, #tpu.memory_space<smem>>
    %cst_68 = arith.constant 0.000000e+00 : f32
    %179 = arith.subf %cst_68, %3 : f32
    %180 = arith.mulf %179, %135 : f32
    %c9 = arith.constant 9 : index
    %181 = memref.load %arg7[%c9] : memref<11xf32, #tpu.memory_space<smem>>
    memref.store %180, %arg7[%c9] : memref<11xf32, #tpu.memory_space<smem>>
    %cst_69 = arith.constant 0.000000e+00 : f32
    %182 = arith.subf %cst_69, %3 : f32
    %183 = arith.mulf %182, %140 : f32
    %c10 = arith.constant 10 : index
    %184 = memref.load %arg7[%c10] : memref<11xf32, #tpu.memory_space<smem>>
    memref.store %183, %arg7[%c10] : memref<11xf32, #tpu.memory_space<smem>>
    return
  }
}

</mosaic_0001>

<bundles_post_ra>
// kernel: opt_landmark_loss.1
= control target key start
LH: loop header
LB: loop body
LE: loop exit
PB: predicated region body
PF: predicated region fallthrough
CT: control target
= control target key end

     0   :  { %14 = vsyncpa [#allocation6], 0  ;;  %s612_s0 = inlined_call_operand.<no memory space> [shape: f32[1], index: 0, kind: input, shape index: {}]   ;;  %s613_s1 = inlined_call_operand.<no memory space> [shape: f32[1], index: 1, kind: input, shape index: {}]   ;;  %s614_s2 = inlined_call_operand.vmem [shape: f32[3,1], index: 2, kind: input, shape index: {}]   ;;  %s615_s3 = inlined_call_operand.vmem [shape: f32[3,1], index: 3, kind: input, shape index: {}]   ;;  %s616_s4 = inlined_call_operand.vmem [shape: f32[3,3], index: 4, kind: input, shape index: {}]   ;;  %s617_s5 = inlined_call_operand.vmem [shape: f32[3,3], index: 5, kind: input, shape index: {}]   ;;  %s618_s6 = inlined_call_operand.vmem [shape: f32[8,128], index: 6, kind: input, shape index: {}]   ;;  %s619_s7 = inlined_call_operand.hbm [shape: f32[11], index: 7, kind: output, shape index: {}]  }
   0x1   :  { %15 = vsyncpa [#allocation8], 0 }
   0x2   :  { %16 = vsyncpa [#allocation11], 0  ;;  %s38_s26 = sshll.u32 %s615_s3, 4  ;;  %s39_s26 = int_to_ptr.vmem [resolvable:$true] %s38_s26 }
   0x3   :  { %17 = vsyncpa [#allocation5], 0  ;;  %s28_s29 = sshll.u32 %s614_s2, 4  ;;  %s400_s30 = scalar_lea.vmem %s39_s26, 64  ;;  %s29_s29 = int_to_ptr.vmem [resolvable:$true] %s28_s29 }
   0x4   :  { %p401_p0 = scmp.ne.s32.totalorder %s39_s26, %s400_s30  ;;  %p405_p1 = scmp.lt.s32.totalorder %s39_s26, %s39_s26 }
   0x5   :  { %p406_p2 = scmp.lt.s32.totalorder %s400_s30, %s400_s30 }
   0x7   :  { %p407_p3 = por %p406_p2, %p405_p1 }
   0x9   :  { %p408_p4 = pnand %p407_p3, %p401_p0 }
   0xb   :  { %411 = shalt.err (!%p408_p4)
}
   0xc   :  { %s466_s8 = smov [#allocation7]   ;;  %s412_s9 = scalar_lea.vmem %s29_s29, 64 }
   0xd   :  { %41 = dma.vmem_to_smem %s39_s26, 64, %s466_s8, [#allocation8]  }
   0xe   :  { %p413_p5 = scmp.ne.s32.totalorder %s29_s29, %s412_s9  ;;  %p417_p6 = scmp.lt.s32.totalorder %s29_s29, %s29_s29 }
   0xf   :  { %p418_p7 = scmp.lt.s32.totalorder %s412_s9, %s412_s9 }
  0x11   :  { %p419_p8 = por %p418_p7, %p417_p6 }
  0x13   :  { %p420_p9 = pnand %p419_p8, %p413_p5 }
  0x15   :  { %423 = shalt.err (!%p420_p9)
}
  0x16   :  { %s467_s3 = smov [#allocation4]   ;;  %s48_s11 = sshll.u32 %s616_s4, 4  ;;  %s49_s11 = int_to_ptr.vmem [resolvable:$true] %s48_s11 }
  0x17   :  { %31 = dma.vmem_to_smem %s29_s29, 64, %s467_s3, [#allocation6]  }
  0x18   :  { %s58_s14 = sshll.u32 %s617_s5, 4  ;;  %s424_s15 = scalar_lea.vmem %s49_s11, 64  ;;  %s59_s14 = int_to_ptr.vmem [resolvable:$true] %s58_s14 }
  0x19   :  { %p425_p10 = scmp.ne.s32.totalorder %s49_s11, %s424_s15  ;;  %p429_p11 = scmp.lt.s32.totalorder %s49_s11, %s49_s11 }
  0x1a   :  { %p430_p12 = scmp.lt.s32.totalorder %s424_s15, %s424_s15 }
  0x1c   :  { %p431_p13 = por %p430_p12, %p429_p11 }
  0x1e   :  { %p432_p0 = pnand %p431_p13, %p425_p10 }
  0x20   :  { %435 = shalt.err (!%p432_p0)
}
  0x21   :  { %s468_s16 = smov [#allocation9]   ;;  %s436_s17 = scalar_lea.vmem %s59_s14, 64 }
  0x22   :  { %51 = dma.vmem_to_smem %s49_s11, 64, %s468_s16, [#allocation8]  }
  0x23   :  { %p437_p1 = scmp.ne.s32.totalorder %s59_s14, %s436_s17  ;;  %p441_p2 = scmp.lt.s32.totalorder %s59_s14, %s59_s14 }
  0x24   :  { %p442_p3 = scmp.lt.s32.totalorder %s436_s17, %s436_s17 }
  0x26   :  { %p443_p4 = por %p442_p3, %p441_p2 }
  0x28   :  { %p444_p5 = pnand %p443_p4, %p437_p1 }
  0x2a   :  { %447 = shalt.err (!%p444_p5)
}
  0x2b   :  { %s469_s4 = smov [#allocation10]  }
  0x2c   :  { %61 = dma.vmem_to_smem %s59_s14, 64, %s469_s4, [#allocation11]  }
  0x2d   :  { %458 = dma.done.wait [#allocation6], 64  }
  0x2e   :  { %459 = vsyncadd [#allocation6], 4294967232 }
  0x2f   :  { %460 = dma.done.wait [#allocation8], 128  }
  0x30   :  { %461 = vsyncadd [#allocation8], 4294967168 }
  0x31   :  { %462 = dma.done.wait [#allocation11], 64  }
  0x32   :  { %463 = vsyncadd [#allocation11], 4294967232 }
  0x33   :  { %76 = sfence }
  0x34   :  { %s79_s21 = sadd.f32 %s613_s1, %s612_s0  ;;  %s81_s22 = sld [smem:[#allocation4]]  ;;  %v108_v0 = vld [vmem:[%s618_s6] sm:$0xff]  ;;  %v470_v36 = vmov 0.0   ;;  %vm163_vm2 = vcmask 1040384  }
  0x35   :  { %s82_s23 = sld [smem:[#allocation7]]  ;;  %s368_s8 = sld [smem:[#allocation9 + $0x81]]  ;;  %v154_v26 = vrot.slane %v108_v0, 4  ;;  %v147_v34 = vrot.slane %v108_v0, 3  ;;  %v160_v35 = vrot.slane %v108_v0, 5 }
  0x36   :  { %s358_s24 = sld [smem:[#allocation4 + $0x80]]  ;;  %s530_s25 = smul.f32 2.5, %s79_s21 }
  0x37   :  { %s359_s26 = sld [smem:[#allocation7 + $0x80]]  ;;  %s369_s9 = sld [smem:[#allocation10 + $0x81]] }
  0x38   :  { %s360_s27 = sld [smem:[#allocation4 + $0x100]]  ;;  %s370_s3 = sld [smem:[#allocation9 + $0x82]]  ;;  %v143_v30 = vstv %s530_s25 }
  0x39   :  { %s361_s28 = sld [smem:[#allocation7 + $0x100]]  ;;  %s371_s2 = sld [smem:[#allocation10 + $0x82]] }
  0x3a   :  { %s366_s29 = sld [smem:[#allocation9 + $0x80]]  ;;  %s362_s15 = sld [smem:[#allocation9 + $0x1]] }
  0x3b   :  { %s367_s30 = sld [smem:[#allocation10 + $0x80]]  ;;  %s83_s10 = sadd.f32 %s82_s23, %s81_s22 }
  0x3c   :  { %s90_s11 = sld [smem:[#allocation9]]  ;;  %s363_s17 = sld [smem:[#allocation10 + $0x1]] }
  0x3d   :  { %s86_s12 = sadd.f32 %s359_s26, %s358_s24  ;;  %s91_s0 = sld [smem:[#allocation10]]  ;;  %v109_v1 = vstv %s83_s10 }
  0x3e   :  { %v537_v2 = vsub.f32 %v108_v0, %v109_v1  ;;  %s539_s4 = sadd.f32 %s369_s9, %s368_s8  ;;  %s364_s5 = sld [smem:[#allocation9 + $0x2]] }
  0x3f   :  { %s89_s1 = sadd.f32 %s361_s28, %s360_s27  ;;  %v111_v3 = vstv %s86_s12  ;;  %s365_s18 = sld [smem:[#allocation10 + $0x2]] }
  0x40   :  { %v541_v4 = vsub.f32 %v108_v0, %v111_v3  ;;  %s543_s6 = sadd.f32 %s371_s2, %s370_s3  ;;  %v131_v8 = vstv %s539_s4 }
  0x41   :  { %s535_s16 = sadd.f32 %s367_s30, %s366_s29  ;;  %v113_v5 = vstv %s89_s1 }
  0x42   :  { %v545_v6 = vsub.f32 %v108_v0, %v113_v5  ;;  %v132_v10 = vmul.f32 %v131_v8, %v541_v4  ;;  %v137_v11 = vstv %s543_s6  ;;  %s556_s20 = ssub.f32 0.0, %s530_s25  ;;  %v218_v53 = vrot.slane %v541_v4, 1 }
  0x43   :  { %v129_v7 = vstv %s535_s16  ;;  %s552_s19 = sadd.f32 %s91_s0, %s90_s11 }
  0x44   :  { %v130_v9 = vmul.f32 %v129_v7, %v537_v2  ;;  %v138_v12 = vmul.f32 %v137_v11, %v545_v6  ;;  %v134_v13 = vrot.slane %v132_v10, 1  ;;  %s558_s21 = sadd.f32 %s363_s17, %s362_s15  ;;  %v151_v18 = vstv %s556_s20 }
  0x45   :  { %v115_v14 = vstv %s552_s19  ;;  %s561_s22 = sadd.f32 %s365_s18, %s364_s5  ;;  %v232_v50 = vrot.slane %v545_v6, 2 }
  0x46   :  { %v140_v15 = vrot.slane %v138_v12, 2  ;;  %v136_v16 = vadd.f32 %v134_v13, %v130_v9  ;;  %v117_v17 = vstv %s558_s21  ;;  %v116_v19 = vmul.f32 %v115_v14, %v537_v2 }
  0x47   :  { %v118_v20 = vmul.f32 %v117_v17, %v541_v4  ;;  %v123_v22 = vstv %s561_s22 }
  0x48   :  { %v142_v21 = vadd.f32 %v140_v15, %v136_v16  ;;  %v124_v24 = vmul.f32 %v123_v22, %v545_v6 }
  0x49   :  { %v120_v23 = vrot.slane %v118_v20, 1 }
  0x4a   :  { %v152_v25 = vmul.f32 %v151_v18, %v142_v21  ;;  %v126_v28 = vrot.slane %v124_v24, 2 }
  0x4b   :  { %v122_v27 = vadd.f32 %v120_v23, %v116_v19 }
  0x4c   :  { %v153_v29 = vadd.f32 255.0, %v152_v25 }
  0x4d   :  { %v128_v31 = vadd.f32 %v126_v28, %v122_v27 }
  0x4e   :  { %v156_v32 = vsub.f32 %v153_v29, %v154_v26 }
  0x4f   :  { %v144_v33 = vmul.f32 %v143_v30, %v128_v31 }
  0x50   :  { %vm180_vm0 = vcmp.gt.f32.partialorder %v156_v32, 0.0  ;;  %vm182_vm1 = vcmp.lt.f32.partialorder %v156_v32, 0.0  ;;  %v158_v42 = vand.u32 2147483647, %v156_v32 }
  0x51   :  { %v181_v37 = vsel %vm180_vm0, 1.0, %v470_v36  ;;  %v183_v38 = vsel %vm182_vm1, 1.0, %v470_v36  ;;  %v145_v39 = vadd.f32 255.0, %v144_v33 }
  0x52   :  { %v184_v40 = vsub.f32 %v181_v37, %v183_v38 }
  0x53   :  { %v149_v41 = vsub.f32 %v145_v39, %v147_v34 }
  0x54   :  { %v185_v43 = vmul.f32 %v184_v40, %v160_v35 }
  0x55   :  { %v157_v44 = vand.u32 2147483647, %v149_v41  ;;  %vm174_vm3 = vcmp.gt.f32.partialorder %v149_v41, 0.0  ;;  %vm176_vm4 = vcmp.lt.f32.partialorder %v149_v41, 0.0 }
  0x56   :  { %v196_v45 = vsel %vm163_vm2, %v185_v43, 0.0  ;;  %v175_v46 = vsel %vm174_vm3, 1.0, %v470_v36  ;;  %v177_v47 = vsel %vm176_vm4, 1.0, %v470_v36  ;;  %v256_v61 = vmul.f32 %v218_v53, %v185_v43 }
  0x57   :  { %197 = vadd.xlane.f32.xlu1 %v196_v45  ;;  %v159_v48 = vadd.f32 %v158_v42, %v157_v44  ;;  %v178_v49 = vsub.f32 %v175_v46, %v177_v47  ;;  %v245_v63 = vmul.f32 %v185_v43, %v537_v2  ;;  %v267_v4 = vmul.f32 %v232_v50, %v185_v43 }
  0x58   :  { %v257_v0 = vsel %vm163_vm2, %v256_v61, 0.0  ;;  %v289_v7 = vmul.f32 %v185_v43, %v142_v21 }
  0x59   :  { %v162_v51 = vmul.f32 %v160_v35, %v159_v48  ;;  %v179_v52 = vmul.f32 %v178_v49, %v160_v35  ;;  %v246_v3 = vsel %vm163_vm2, %v245_v63, 0.0  ;;  %v268_v6 = vsel %vm163_vm2, %v267_v4, 0.0 }
  0x5a   :  { %v290_v8 = vsel %vm163_vm2, %v289_v7, 0.0 }
  0x5b   :  { %v164_v54 = vsel %vm163_vm2, %v162_v51, 0.0  ;;  %v206_v55 = vmul.f32 %v179_v52, %v537_v2  ;;  %v234_v56 = vmul.f32 %v232_v50, %v179_v52  ;;  %v186_v58 = vsel %vm163_vm2, %v179_v52, 0.0 }
  0x5c   :  { %165 = vadd.xlane.f32.xlu0 %v164_v54  ;;  %v220_v59 = vmul.f32 %v218_v53, %v179_v52  ;;  %v278_v1 = vmul.f32 %v179_v52, %v128_v31 }
  0x5d   :  { %v207_v57 = vsel %vm163_vm2, %v206_v55, 0.0  ;;  %v235_v60 = vsel %vm163_vm2, %v234_v56, 0.0 }
  0x5e   :  { %208 = vadd.xlane.f32.xlu1 %v207_v57  ;;  %v221_v62 = vsel %vm163_vm2, %v220_v59, 0.0  ;;  %v279_v5 = vsel %vm163_vm2, %v278_v1, 0.0 }
  0x60   :  { %187 = vadd.xlane.f32.xlu0 %v186_v58 }
  0x62   :  { %236 = vadd.xlane.f32.xlu1 %v235_v60 }
  0x64   :  { %222 = vadd.xlane.f32.xlu0 %v221_v62 }
  0x66   :  { %258 = vadd.xlane.f32.xlu1 %v257_v0 }
  0x68   :  { %247 = vadd.xlane.f32.xlu0 %v246_v3 }
  0x6a   :  { %280 = vadd.xlane.f32.xlu1 %v279_v5 }
  0x6c   :  { %269 = vadd.xlane.f32.xlu0 %v268_v6 }
  0x70   :  { %291 = vadd.xlane.f32.xlu0 %v290_v8 }
  0xe4   :  { %v198_v2 = vpop.xlane.xlu1 %197 }
  0xe5   :  { %v199_v9 = vrot.slane %v198_v2, 4 }
  0xe7   :  { %v200_v10 = vadd.f32 %v199_v9, %v198_v2 }
  0xe9   :  { %v166_v11 = vpop.xlane.xlu0 %165  ;;  %v201_v16 = vrot.slane %v200_v10, 2 }
  0xea   :  { %v167_v12 = vrot.slane %v166_v11, 4 }
  0xeb   :  { %v209_v13 = vpop.xlane.xlu1 %208  ;;  %v202_v27 = vadd.f32 %v201_v16, %v200_v10 }
  0xec   :  { %v168_v14 = vadd.f32 %v167_v12, %v166_v11  ;;  %v210_v15 = vrot.slane %v209_v13, 4 }
  0xed   :  { %v188_v17 = vpop.xlane.xlu0 %187  ;;  %v203_v40 = vrot.slane %v202_v27, 1 }
  0xee   :  { %v169_v18 = vrot.slane %v168_v14, 2  ;;  %v211_v19 = vadd.f32 %v210_v15, %v209_v13  ;;  %v189_v20 = vrot.slane %v188_v17, 4 }
  0xef   :  { %v237_v22 = vpop.xlane.xlu1 %236  ;;  %v204_v54 = vadd.f32 %v203_v40, %v202_v27 }
  0xf0   :  { %v212_v21 = vrot.slane %v211_v19, 2  ;;  %v190_v23 = vadd.f32 %v189_v20, %v188_v17  ;;  %v238_v24 = vrot.slane %v237_v22, 4  ;;  %v170_v25 = vadd.f32 %v169_v18, %v168_v14 }
  0xf1   :  { %v223_v26 = vpop.xlane.xlu0 %222 }
  0xf2   :  { %v191_v28 = vrot.slane %v190_v23, 2  ;;  %v239_v29 = vadd.f32 %v238_v24, %v237_v22  ;;  %v224_v30 = vrot.slane %v223_v26, 4  ;;  %v171_v31 = vrot.slane %v170_v25, 1 }
  0xf3   :  { %v259_v32 = vpop.xlane.xlu1 %258  ;;  %v213_v33 = vadd.f32 %v212_v21, %v211_v19 }
  0xf4   :  { %v240_v34 = vrot.slane %v239_v29, 2  ;;  %v225_v35 = vadd.f32 %v224_v30, %v223_v26  ;;  %v260_v36 = vrot.slane %v259_v32, 4  ;;  %v172_v37 = vadd.f32 %v171_v31, %v170_v25 }
  0xf5   :  { %v248_v38 = vpop.xlane.xlu0 %247  ;;  %v192_v39 = vadd.f32 %v191_v28, %v190_v23  ;;  %v214_v41 = vrot.slane %v213_v33, 1 }
  0xf6   :  { %v226_v42 = vrot.slane %v225_v35, 2  ;;  %v261_v43 = vadd.f32 %v260_v36, %v259_v32  ;;  %v249_v44 = vrot.slane %v248_v38, 4  ;;  %372 = vpush %v172_v37  ;;  %v241_v45 = vadd.f32 %v240_v34, %v239_v29 }
  0xf7   :  { %v281_v46 = vpop.xlane.xlu1 %280  ;;  %v193_v47 = vrot.slane %v192_v39, 1  ;;  %v215_v55 = vadd.f32 %v214_v41, %v213_v33 }
  0xf8   :  { %v262_v48 = vrot.slane %v261_v43, 2  ;;  %v250_v49 = vadd.f32 %v249_v44, %v248_v38  ;;  %v282_v50 = vrot.slane %v281_v46, 4  ;;  %v227_v51 = vadd.f32 %v226_v42, %v225_v35 }
  0xf9   :  { %v270_v52 = vpop.xlane.xlu0 %269  ;;  %v194_v53 = vadd.f32 %v193_v47, %v192_v39  ;;  %v242_v56 = vrot.slane %v241_v45, 1 }
  0xfa   :  { %v251_v57 = vrot.slane %v250_v49, 2  ;;  %v283_v58 = vadd.f32 %v282_v50, %v281_v46  ;;  %v271_v59 = vrot.slane %v270_v52, 4  ;;  %v228_v60 = vrot.slane %v227_v51, 1 }
  0xfb   :  { %374 = vpush %v194_v53  ;;  %v243_v61 = vadd.f32 %v242_v56, %v241_v45  ;;  %v263_v62 = vadd.f32 %v262_v48, %v261_v43 }
  0xfc   :  { %v284_v63 = vrot.slane %v283_v58, 2  ;;  %v272_v0 = vadd.f32 %v271_v59, %v270_v52  ;;  %376 = vpush %v204_v54  ;;  %v229_v1 = vadd.f32 %v228_v60, %v227_v51  ;;  %v252_v3 = vadd.f32 %v251_v57, %v250_v49 }
  0xfd   :  { %378 = vpush %v215_v55  ;;  %v292_v4 = vpop.xlane.xlu0 %291  ;;  %v264_v5 = vrot.slane %v263_v62, 1 }
  0xfe   :  { %v285_v6 = vadd.f32 %v284_v63, %v283_v58  ;;  %v273_v7 = vrot.slane %v272_v0, 2  ;;  %v293_v8 = vrot.slane %v292_v4, 4  ;;  %380 = vpush %v229_v1  ;;  %v253_v2 = vrot.slane %v252_v3, 1 }
  0xff   :  { %382 = vpush %v243_v61  ;;  %v265_v9 = vadd.f32 %v264_v5, %v263_v62 }
 0x100   :  { %v294_v10 = vadd.f32 %v293_v8, %v292_v4  ;;  %v254_v11 = vadd.f32 %v253_v2, %v252_v3  ;;  %v274_v12 = vadd.f32 %v273_v7, %v272_v0  ;;  %v286_v13 = vrot.slane %v285_v6, 1 }
 0x102   :  { %v295_v14 = vrot.slane %v294_v10, 2  ;;  %384 = vpush %v254_v11  ;;  %v275_v15 = vrot.slane %v274_v12, 1  ;;  %v287_v16 = vadd.f32 %v286_v13, %v285_v6 }
 0x103   :  { %386 = vpush %v265_v9 }
 0x104   :  { %v296_v17 = vadd.f32 %v295_v14, %v294_v10  ;;  %v276_v18 = vadd.f32 %v275_v15, %v274_v12 }
 0x106   :  { %388 = vpush %v276_v18  ;;  %v297_v19 = vrot.slane %v296_v17, 1 }
 0x107   :  { %390 = vpush %v287_v16 }
 0x108   :  { %v298_v20 = vadd.f32 %v297_v19, %v296_v17 }
 0x10a   :  { %392 = vpush %v298_v20 }
 0x127   :  { %s373_s23 = spop %372 }
 0x128   :  { %301 = sst [smem:[#allocation12]] %s373_s23 }
 0x12c   :  { %s375_s24 = spop %374 }
 0x12d   :  { %s307_s26 = smul.f32 %s375_s24, %s552_s19  ;;  %s377_s27 = spop %376 }
 0x12e   :  { %s313_s28 = smul.f32 %s375_s24, %s558_s21  ;;  %s379_s29 = spop %378 }
 0x12f   :  { %s319_s30 = smul.f32 %s375_s24, %s561_s22  ;;  %s381_s8 = spop %380 }
 0x130   :  { %s306_s9 = smul.f32 %s377_s27, %s535_s16  ;;  %s383_s2 = spop %382 }
 0x131   :  { %s312_s3 = smul.f32 %s377_s27, %s539_s4 }
 0x132   :  { %s308_s10 = ssub.f32 %s306_s9, %s307_s26  ;;  %s318_s11 = smul.f32 %s377_s27, %s543_s6 }
 0x133   :  { %s314_s12 = ssub.f32 %s312_s3, %s313_s28  ;;  %s324_s13 = smul.f32 %s379_s29, %s530_s25 }
 0x134   :  { %s309_s14 = smul.f32 %s308_s10, %s530_s25  ;;  %s320_s0 = ssub.f32 %s318_s11, %s319_s30 }
 0x135   :  { %s315_s1 = smul.f32 %s314_s12, %s530_s25  ;;  %326 = sst [smem:[#allocation12 + $0x5]] %s324_s13 }
 0x136   :  { %311 = sst [smem:[#allocation12 + $0x2]] %s309_s14  ;;  %s321_s15 = smul.f32 %s320_s0, %s530_s25 }
 0x137   :  { %317 = sst [smem:[#allocation12 + $0x3]] %s315_s1  ;;  %s327_s17 = smul.f32 %s381_s8, %s530_s25 }
 0x138   :  { %323 = sst [smem:[#allocation12 + $0x4]] %s321_s15  ;;  %s330_s16 = smul.f32 %s383_s2, %s530_s25 }
 0x139   :  { %329 = sst [smem:[#allocation12 + $0x6]] %s327_s17  ;;  %s385_s4 = spop %384 }
 0x13a   :  { %332 = sst [smem:[#allocation12 + $0x7]] %s330_s16  ;;  %s333_s5 = smul.f32 %s385_s4, %s556_s20 }
 0x13b   :  { %s387_s6 = spop %386  ;;  %s448_s25 = scalar_lea.hbm %s619_s7, 16 }
 0x13c   :  { %335 = sst [smem:[#allocation12 + $0x8]] %s333_s5  ;;  %s336_s18 = smul.f32 %s387_s6, %s556_s20 }
 0x13d   :  { %s389_s19 = spop %388  ;;  %p449_p6 = scmp.ne.s32.totalorder %s619_s7, %s448_s25 }
 0x13e   :  { %338 = sst [smem:[#allocation12 + $0x9]] %s336_s18  ;;  %s339_s21 = smul.f32 %s389_s19, %s556_s20 }
 0x13f   :  { %s391_s22 = spop %390  ;;  %p452_p7 = scmp.lt.u32.totalorder %s448_s25, %s619_s7 }
 0x140   :  { %341 = sst [smem:[#allocation12 + $0xa]] %s339_s21  ;;  %s393_s23 = spop %392 }
 0x141   :  { %s302_s24 = ssub.f32 %s391_s22, %s393_s23  ;;  %p454_p8 = pnand %p452_p7, %p449_p6 }
 0x143   :  { %s303_s26 = smul.f32 2.5, %s302_s24 }
 0x145   :  { %305 = sst [smem:[#allocation12 + $0x1]] %s303_s26 }
 0x146   :  { %457 = shalt.err (!%p454_p8)
}
 0x147   :  { %s471_s20 = smov [#allocation12]  }
 0x148   :  { %349 = dma.smem_to_hbm %s471_s20, 16, %s619_s7, [#allocation5]  }
 0x149   :  { %464 = dma.done.wait [#allocation5], 16  }
 0x14a   :  { %465 = vsyncadd [#allocation5], 4294967280 }
 0x14b   :  { %353 = sfence }
 0x14c   :  { %354 = vsyncpa [#allocation5], 1 }
 0x14d   :  { %355 = vsyncpa [#allocation6], 1 }
 0x14e   :  { %356 = vsyncpa [#allocation8], 1 }
 0x14f   :  { %357 = vsyncpa [#allocation11], 1 }

</bundles_post_ra>
